<compile_context>
chip_gen: v7x
topology: tpu7x:2x2x1
jax: 0.10.0
libtpu: 0.0.40
codegen_flags: <defaults>
</compile_context>

<pallas_src>
import jax
import jax.numpy as jnp
from jax import lax
from jax.experimental import pallas as pl
from jax.experimental.pallas import tpu as pltpu

_LANE = 128
_ROW_ALIGN = 16   # row granularity: multiple of 16 keeps bf16-packed dynamic
                  # sublane slices tile-aligned (and satisfies f32's 8).


def _round_up(v, m):
    return (v + m - 1) // m * m


# --------------------------------------------------------------------------
# Fused kernel factory: GCN layers + standardization epilogue
# --------------------------------------------------------------------------
def _make_kernel(num_layers, tm, n_true, resident):
    def kernel(s_ref, x_ref, w_ref, b_ref, o_ref,
               act_ref, z_ref, mu_ref, isd_ref, *rest):
        l = pl.program_id(0)          # 0..num_layers-1: GCN layers; num_layers: epilogue
        i = pl.program_id(1)          # row-tile index
        cdt = z_ref.dtype             # MXU compute dtype (bf16 by default)
        row0 = pl.multiple_of(i * tm, tm)

        # ---- one-time setup at the very first grid step --------------------
        @pl.when((l == 0) & (i == 0))
        def _():
            if resident:
                s_vmem, s_sem = rest
                cp = pltpu.make_async_copy(s_ref, s_vmem, s_sem)
                cp.start()            # single HBM read of S, overlapped with X @ W0
            # Z_0 = X @ W_0 (whole array, once).
            z_ref[0] = jnp.dot(
                x_ref[...], w_ref[0],
                preferred_element_type=jnp.float32).astype(cdt)
            if resident:
                cp.wait()

        # ---- GCN layer phase ------------------------------------------------
        @pl.when(l < num_layers)
        def _():
            cur = l % 2               # Z_l lives in ping-pong slot l % 2
            if resident:
                s_tile = rest[0][pl.ds(row0, tm), :]
            else:
                s_tile = s_ref[...]
            # y = S[tile] @ Z_l + b_l   (MXU, f32 accumulation)
            y = jnp.dot(s_tile, z_ref[cur],
                        preferred_element_type=jnp.float32) + b_ref[l]

            @pl.when(l < num_layers - 1)   # hidden layers: sigmoid + pipelined Z_{l+1}
            def _():
                a = jax.nn.sigmoid(y)
                act_ref[pl.ds(row0, tm), :] = a
                # Project this tile for the next layer now, hiding the (N,C)x(C,C)
                # matmul behind the aggregation instead of a per-layer bubble.
                z_ref[1 - cur, pl.ds(row0, tm), :] = jnp.dot(
                    a.astype(cdt), w_ref[l + 1],
                    preferred_element_type=jnp.float32).astype(cdt)

            @pl.when(l == num_layers - 1)  # last layer: linear
            def _():
                act_ref[pl.ds(row0, tm), :] = y

        # ---- standardization epilogue (extra grid "layer") ------------------
        @pl.when(l == num_layers)
        def _():
            @pl.when(i == 0)
            def _():
                # Column mean / unbiased std over the true (unpadded) rows only.
                xf = act_ref[...]
                ridx = lax.broadcasted_iota(jnp.int32, xf.shape, 0)
                valid = (ridx < n_true).astype(jnp.float32)
                mean = jnp.sum(xf * valid, axis=0, keepdims=True) * (1.0 / n_true)
                d = (xf - mean) * valid
                var = jnp.sum(d * d, axis=0, keepdims=True) * (
                    1.0 / max(n_true - 1, 1))
                mu_ref[...] = mean
                isd_ref[...] = lax.rsqrt(var)
            xt = act_ref[pl.ds(row0, tm), :]
            o_ref[...] = ((xt - mu_ref[...]) * isd_ref[...]).astype(o_ref.dtype)

    return kernel


# --------------------------------------------------------------------------
# Wrapper / planning
# --------------------------------------------------------------------------
def _normalized_adjacency(edge_index, num_nodes):
    """Dense D^{-1/2} (A + I) D^{-1/2} in f32 (static per graph; cache in real use)."""
    row, col = edge_index[0], edge_index[1]
    loop = jnp.arange(num_nodes, dtype=edge_index.dtype)
    row = jnp.concatenate([row, loop])
    col = jnp.concatenate([col, loop])
    a = jnp.zeros((num_nodes, num_nodes), jnp.float32).at[col, row].add(1.0)
    dinv = jax.lax.rsqrt(a.sum(axis=1))
    return dinv[:, None] * a * dinv[None, :]


def _vmem_budget_bytes():
    cap = None
    try:
        cap = getattr(pltpu.get_tpu_info(), "vmem_capacity_bytes", None)
    except Exception:
        cap = None
    if not cap or cap <= 0:
        cap = 64 * 1024 * 1024        # conservative (v7x-sized) fallback
    # Leave ~25% headroom for compiler-internal scratch:
    # ~48 MiB usable on v7x (64 MiB physical), ~96 MiB on v5e/v6e (128 MiB).
    return int(cap) * 3 // 4


def _plan_tiling(n, c_pad, num_layers, sbytes, budget, allow_resident=True):
    """Pick (row_tile, padded_n, s_resident) under the VMEM budget."""
    max_tm = max(_round_up(n, _ROW_ALIGN), _ROW_ALIGN)
    cands = [t for t in (1024, 512, 256, 128, 64, 32, 16) if t <= max_tm] or [_ROW_ALIGN]

    def fixed_bytes(tm, n_pad):
        return (2 * n_pad * c_pad * sbytes                  # X (resident, dbl-buffered)
                + 2 * num_layers * c_pad * c_pad * sbytes   # all layer weights
                + 2 * num_layers * 8 * c_pad * 4            # biases (sublane padded)
                + 2 * tm * c_pad * 4                        # output tile (dbl-buffered)
                + n_pad * c_pad * 4                         # running activation scratch
                + 2 * n_pad * c_pad * sbytes                # Z ping-pong scratch
                + 2 * 8 * c_pad * 4)                        # mean / inv-std scratch

    stream_choice = None
    for tm in cands:                                        # largest tile first
        n_pad = _round_up(n, tm)
        base = fixed_bytes(tm, n_pad)
        if allow_resident and base + n_pad * n_pad * sbytes <= budget:
            return tm, n_pad, True
        if stream_choice is None and base + 2 * tm * n_pad * sbytes <= budget:
            stream_choice = (tm, n_pad, False)
    if stream_choice is not None:
        return stream_choice
    tm = cands[-1]
    return tm, _round_up(n, tm), False


def cca_gca_forward_eval(x, edge_index, params, compute_dtype=jnp.bfloat16,
                         force_streaming=False, vmem_budget_bytes=None):
    """Eval-path forward of CCA_GCA_aug_homo, fully fused in one Pallas call."""
    n, c_in = x.shape
    num_layers = len(params)
    c_out = params[-1][0].shape[1]
    c_pad = _round_up(
        max([c_in] + [w.shape[0] for w, _ in params] + [w.shape[1] for w, _ in params]),
        _LANE)
    sbytes = jnp.dtype(compute_dtype).itemsize

    budget = int(vmem_budget_bytes) if vmem_budget_bytes else _vmem_budget_bytes()
    tm, n_pad, resident = _plan_tiling(
        n, c_pad, num_layers, sbytes, budget, allow_resident=not force_streaming)
    num_tiles = n_pad // tm

    # Dense normalized adjacency, zero-padded to (n_pad, n_pad), in MXU dtype.
    s_pad = jnp.zeros((n_pad, n_pad), compute_dtype).at[:n, :n].set(
        _normalized_adjacency(edge_index, n).astype(compute_dtype))

    # Node features / weights pre-cast to the MXU dtype; bias stays f32
    # (added after the f32 accumulation).
    x_pad = jnp.zeros((n_pad, c_pad), compute_dtype).at[:n, :c_in].set(
        x.astype(compute_dtype))
    w_all = jnp.zeros((num_layers, c_pad, c_pad), compute_dtype)
    b_all = jnp.zeros((num_layers, 1, c_pad), jnp.float32)
    for li, (w, b) in enumerate(params):
        ci, co = w.shape
        w_all = w_all.at[li, :ci, :co].set(w.astype(compute_dtype))
        b_all = b_all.at[li, 0, :co].set(b.astype(jnp.float32))

    if resident:
        s_spec = pl.BlockSpec(memory_space=pl.ANY)     # raw HBM ref; DMA'd once
    else:
        # Stream row tiles; pin the index during the epilogue so no extra DMA.
        s_spec = pl.BlockSpec(
            (tm, n_pad),
            lambda l, i: (jnp.where(l == num_layers, num_tiles - 1, i), 0))

    # Output stays on block (0,0) (never written) during the layers; the
    # epilogue writes tile i per step -> tiled, lane-dense, pipelined writeback.
    out_spec = pl.BlockSpec(
        (tm, c_pad), lambda l, i: (jnp.where(l == num_layers, i, 0), 0))

    scratch = [
        pltpu.VMEM((n_pad, c_pad), jnp.float32),        # running activation
        pltpu.VMEM((2, n_pad, c_pad), compute_dtype),   # Z_l / Z_{l+1} ping-pong
        pltpu.VMEM((1, c_pad), jnp.float32),            # column mean
        pltpu.VMEM((1, c_pad), jnp.float32),            # column 1/std
    ]
    if resident:
        scratch += [pltpu.VMEM((n_pad, n_pad), compute_dtype),  # VMEM-resident S
                    pltpu.SemaphoreType.DMA]

    kernel = _make_kernel(num_layers, tm, n, resident)

    out = pl.pallas_call(
        kernel,
        out_shape=jax.ShapeDtypeStruct((n_pad, c_pad), jnp.float32),
        grid_spec=pltpu.PrefetchScalarGridSpec(
            num_scalar_prefetch=0,
            grid=(num_layers + 1, num_tiles),
            in_specs=[
                s_spec,                                                    # S
                pl.BlockSpec((n_pad, c_pad), lambda l, i: (0, 0)),         # X (resident)
                pl.BlockSpec((num_layers, c_pad, c_pad),
                             lambda l, i: (0, 0, 0)),                      # all W
                pl.BlockSpec((num_layers, 1, c_pad),
                             lambda l, i: (0, 0, 0)),                      # all b
            ],
            out_specs=out_spec,
            scratch_shapes=scratch,
        ),
        compiler_params=pltpu.CompilerParams(
            dimension_semantics=("arbitrary", "arbitrary"),
            vmem_limit_bytes=int(max(budget, 32 * 1024 * 1024)),
        ),
    )(s_pad, x_pad, w_all, b_all)
    return out[:n, :c_out]


# --------------------------------------------------------------------------
# Pure-JAX references (f32 and matched-precision) for correctness checks
# --------------------------------------------------------------------------
def reference_forward(x, edge_index, params, compute_dtype=jnp.float32):
    s = _normalized_adjacency(edge_index, x.shape[0]).astype(compute_dtype)
    num_layers = len(params)
    h = x.astype(jnp.float32)
    for li, (w, b) in enumerate(params):
        z = jnp.dot(h.astype(compute_dtype), w.astype(compute_dtype),
                    preferred_element_type=jnp.float32).astype(compute_dtype)
        h = jnp.dot(s, z, preferred_element_type=jnp.float32) + b[None, :]
        if li < num_layers - 1:
            h = jax.nn.sigmoid(h)
    mean = h.mean(0, keepdims=True)
    d = h - mean
    var = (d * d).sum(0, keepdims=True) / (h.shape[0] - 1)
    return d / jnp.sqrt(var)


# --------------------------------------------------------------------------
if __name__ == "__main__":
    key = jax.random.PRNGKey(0)

    # channel_lst = [(16, 32), (32, 8)] -> 2 GCNConv layers, sigmoid between
    channel_lst = [(16, 32), (32, 8)]
    num_nodes = 48   # not a multiple of the 32-row tile -> exercises row padding/masking

    key, kx = jax.random.split(key)
    x = jax.random.normal(kx, (num_nodes, channel_lst[0][0]), dtype=jnp.float32)

    # deterministic graph: bidirectional ring over the nodes
    src = jnp.arange(num_nodes, dtype=jnp.int32)
    dst = (src + 1) % num_nodes
    edge_index = jnp.stack(
        [jnp.concatenate([src, dst]), jnp.concatenate([dst, src])], axis=0)  # (2, 2N)

    # deterministic glorot-ish weights + nonzero bias (bias exercises row masking)
    params = []
    for in_ch, out_ch in channel_lst:
        key, kw = jax.random.split(key)
        scale = jnp.sqrt(2.0 / (in_ch + out_ch))
        w = scale * jax.random.normal(kw, (in_ch, out_ch), dtype=jnp.float32)
        b = 0.05 * jnp.ones((out_ch,), dtype=jnp.float32)
        params.append((w, b))

    ref_f32 = jax.block_until_ready(reference_forward(x, edge_index, params, jnp.float32))
    ref_bf16 = jax.block_until_ready(reference_forward(x, edge_index, params, jnp.bfloat16))

    # VMEM-resident-S path (bf16 MXU) + f32 path for strict validation.
    out_bf16 = jax.block_until_ready(cca_gca_forward_eval(x, edge_index, params))
    out_f32 = jax.block_until_ready(
        cca_gca_forward_eval(x, edge_index, params, compute_dtype=jnp.float32))
    # Streaming-S fallback path (used automatically when S exceeds the VMEM budget).
    out_stream = jax.block_until_ready(
        cca_gca_forward_eval(x, edge_index, params, force_streaming=True))

    assert out_bf16.shape == (num_nodes, channel_lst[-1][1])
    assert out_f32.shape == (num_nodes, channel_lst[-1][1])
    assert jnp.allclose(out_f32, ref_f32, atol=5e-4, rtol=5e-4), \
        "f32-mode kernel mismatch vs f32 JAX reference"
    assert jnp.allclose(out_bf16, ref_bf16, atol=5e-3, rtol=5e-3), \
        "bf16-mode kernel mismatch vs matched-precision JAX reference"
    assert jnp.allclose(out_stream, ref_bf16, atol=5e-3, rtol=5e-3), \
        "streaming-S kernel mismatch vs matched-precision JAX reference"

    print("KERNEL_OK")
</pallas_src>

<mosaic_0001>
module attributes {stable_mosaic.version = 11 : i64} {
  func.func @kernel(%arg0: i32, %arg1: i32, %arg2: memref<64x64xbf16, #tpu.memory_space<any>>, %arg3: memref<64x128xbf16, #tpu.memory_space<vmem>>, %arg4: memref<2x128x128xbf16, #tpu.memory_space<vmem>>, %arg5: memref<2x1x128xf32, #tpu.memory_space<vmem>>, %arg6: memref<32x128xf32, #tpu.memory_space<vmem>>, %arg7: memref<64x128xf32, #tpu.memory_space<vmem>>, %arg8: memref<2x64x128xbf16, #tpu.memory_space<vmem>>, %arg9: memref<1x128xf32, #tpu.memory_space<vmem>>, %arg10: memref<1x128xf32, #tpu.memory_space<vmem>>, %arg11: memref<64x64xbf16, #tpu.memory_space<vmem>>, %arg12: memref<!tpu.dma_semaphore, #tpu.memory_space<semaphore_mem>>) attributes {dimension_semantics = [#tpu.dimension_semantics<arbitrary>, #tpu.dimension_semantics<arbitrary>], iteration_bounds = array<i64: 3, 2>, scalar_prefetch = 0 : i64, scratch_operands = 6 : i64, tpu.core_type = #tpu.core_type<tc>, window_params = [{}, {pipeline_mode = #tpu.pipeline_mode<synchronous>, transform_indices = @transform_1, window_bounds = array<i64: 64, 128>}, {pipeline_mode = #tpu.pipeline_mode<synchronous>, transform_indices = @transform_2, window_bounds = array<i64: 2, 128, 128>}, {pipeline_mode = #tpu.pipeline_mode<synchronous>, transform_indices = @transform_3, window_bounds = array<i64: 2, 1, 128>}, {transform_indices = @transform_4, window_bounds = array<i64: 32, 128>}]} {
    %c32_i32 = arith.constant 32 : i32
    %0 = arith.muli %arg1, %c32_i32 : i32
    %1 = tpu.assume_multiple %0, 32 : i32
    %c0_i32 = arith.constant 0 : i32
    %2 = arith.cmpi eq, %arg0, %c0_i32 : i32
    %c0_i32_0 = arith.constant 0 : i32
    %3 = arith.cmpi eq, %arg1, %c0_i32_0 : i32
    %4 = arith.andi %2, %3 : i1
    %5 = arith.extui %4 : i1 to i32
    %c0_i32_1 = arith.constant 0 : i32
    %6 = arith.cmpi ne, %5, %c0_i32_1 : i32
    scf.if %6 {
      tpu.enqueue_dma source(%arg2 : memref<64x64xbf16, #tpu.memory_space<any>>) target(%arg11 : memref<64x64xbf16, #tpu.memory_space<vmem>>) target_semaphore(%arg12 : memref<!tpu.dma_semaphore, #tpu.memory_space<semaphore_mem>>)
      %c0 = arith.constant 0 : index
      %c0_5 = arith.constant 0 : index
      %13 = vector.load %arg3[%c0, %c0_5] : memref<64x128xbf16, #tpu.memory_space<vmem>>, vector<64x128xbf16>
      %c0_6 = arith.constant 0 : index
      %c0_7 = arith.constant 0 : index
      %c0_8 = arith.constant 0 : index
      %14 = vector.load %arg4[%c0_6, %c0_7, %c0_8] : memref<2x128x128xbf16, #tpu.memory_space<vmem>>, vector<1x128x128xbf16>
      %15 = vector.shape_cast %14 : vector<1x128x128xbf16> to vector<128x128xbf16>
      %cst = arith.constant dense<0.000000e+00> : vector<64x128xf32>
      %16 = tpu.matmul %13, %15, %cst {dimension_numbers = #tpu.dot_dimension_numbers<[1], [0], [0], [1], [0, 0, 1, 1], [], []>} : vector<64x128xbf16>, vector<128x128xbf16>, vector<64x128xf32> -> vector<64x128xf32>
      %17 = arith.truncf %16 : vector<64x128xf32> to vector<64x128xbf16>
      %c0_9 = arith.constant 0 : index
      %c0_10 = arith.constant 0 : index
      %c0_11 = arith.constant 0 : index
      %18 = vector.load %arg8[%c0_9, %c0_10, %c0_11] : memref<2x64x128xbf16, #tpu.memory_space<vmem>>, vector<1x64x128xbf16>
      %19 = vector.shape_cast %18 : vector<1x64x128xbf16> to vector<64x128xbf16>
      %20 = vector.shape_cast %17 : vector<64x128xbf16> to vector<1x64x128xbf16>
      tpu.vector_store %arg8[%c0_9, %c0_10, %c0_11], %20 {strides = array<i32>} : memref<2x64x128xbf16, #tpu.memory_space<vmem>>, vector<1x64x128xbf16>,
      tpu.wait_dma2 semaphore(%arg12 : memref<!tpu.dma_semaphore, #tpu.memory_space<semaphore_mem>>) src(%arg2 : memref<64x64xbf16, #tpu.memory_space<any>>) dst(%arg11 : memref<64x64xbf16, #tpu.memory_space<vmem>>)
    } else {
    }
    %c2_i32 = arith.constant 2 : i32
    %7 = arith.cmpi slt, %arg0, %c2_i32 : i32
    %8 = arith.extui %7 : i1 to i32
    %c0_i32_2 = arith.constant 0 : i32
    %9 = arith.cmpi ne, %8, %c0_i32_2 : i32
    scf.if %9 {
      %c2_i32_5 = arith.constant 2 : i32
      %c0_i32_6 = arith.constant 0 : i32
      %13 = arith.cmpi eq, %c2_i32_5, %c0_i32_6 : i32
      %c1_i32 = arith.constant 1 : i32
      %14 = arith.select %13, %c1_i32, %c2_i32_5 : i32
      %15 = arith.remsi %arg0, %14 : i32
      %c0_i32_7 = arith.constant 0 : i32
      %16 = arith.cmpi ne, %15, %c0_i32_7 : i32
      %c0_i32_8 = arith.constant 0 : i32
      %17 = arith.cmpi slt, %15, %c0_i32_8 : i32
      %c0_i32_9 = arith.constant 0 : i32
      %18 = arith.cmpi slt, %14, %c0_i32_9 : i32
      %19 = arith.xori %17, %18 : i1
      %20 = arith.andi %19, %16 : i1
      %21 = arith.addi %15, %14 : i32
      %22 = arith.select %20, %21, %15 : i32
      %23 = arith.index_cast %1 : i32 to index
      %c0 = arith.constant 0 : index
      %24 = vector.load %arg11[%23, %c0] : memref<64x64xbf16, #tpu.memory_space<vmem>>, vector<32x64xbf16>
      %25 = arith.index_cast %22 : i32 to index
      %c0_10 = arith.constant 0 : index
      %c0_11 = arith.constant 0 : index
      %26 = vector.load %arg8[%25, %c0_10, %c0_11] : memref<2x64x128xbf16, #tpu.memory_space<vmem>>, vector<1x64x128xbf16>
      %27 = vector.shape_cast %26 : vector<1x64x128xbf16> to vector<64x128xbf16>
      %cst = arith.constant dense<0.000000e+00> : vector<32x128xf32>
      %28 = tpu.matmul %24, %27, %cst {dimension_numbers = #tpu.dot_dimension_numbers<[1], [0], [0], [1], [0, 0, 1, 1], [], []>} : vector<32x64xbf16>, vector<64x128xbf16>, vector<32x128xf32> -> vector<32x128xf32>
      %29 = arith.index_cast %arg0 : i32 to index
      %c0_12 = arith.constant 0 : index
      %c0_13 = arith.constant 0 : index
      %30 = vector.load %arg5[%29, %c0_12, %c0_13] : memref<2x1x128xf32, #tpu.memory_space<vmem>>, vector<1x1x128xf32>
      %31 = vector.shape_cast %30 : vector<1x1x128xf32> to vector<1x128xf32>
      %32 = vector.broadcast %31 : vector<1x128xf32> to vector<32x128xf32>
      %33 = arith.addf %28, %32 : vector<32x128xf32>
      %c1_i32_14 = arith.constant 1 : i32
      %34 = arith.cmpi slt, %arg0, %c1_i32_14 : i32
      %35 = arith.extui %34 : i1 to i32
      %c0_i32_15 = arith.constant 0 : i32
      %36 = arith.cmpi ne, %35, %c0_i32_15 : i32
      scf.if %36 {
        %40 = arith.negf %33 : vector<32x128xf32>
        %41 = math.exp %40 : vector<32x128xf32>
        %cst_18 = arith.constant 1.000000e+00 : f32
        %42 = vector.broadcast %cst_18 : f32 to vector<32x128xf32>
        %43 = arith.addf %42, %41 : vector<32x128xf32>
        %44 = arith.divf %42, %43 : vector<32x128xf32>
        %45 = arith.index_cast %1 : i32 to index
        %c0_19 = arith.constant 0 : index
        %46 = vector.load %arg7[%45, %c0_19] : memref<64x128xf32, #tpu.memory_space<vmem>>, vector<32x128xf32>
        tpu.vector_store %arg7[%45, %c0_19], %44 {strides = array<i32>} : memref<64x128xf32, #tpu.memory_space<vmem>>, vector<32x128xf32>,
        %47 = arith.truncf %44 : vector<32x128xf32> to vector<32x128xbf16>
        %c1_i32_20 = arith.constant 1 : i32
        %48 = arith.addi %arg0, %c1_i32_20 : i32
        %49 = arith.index_cast %48 : i32 to index
        %c0_21 = arith.constant 0 : index
        %c0_22 = arith.constant 0 : index
        %50 = vector.load %arg4[%49, %c0_21, %c0_22] : memref<2x128x128xbf16, #tpu.memory_space<vmem>>, vector<1x128x128xbf16>
        %51 = vector.shape_cast %50 : vector<1x128x128xbf16> to vector<128x128xbf16>
        %cst_23 = arith.constant dense<0.000000e+00> : vector<32x128xf32>
        %52 = tpu.matmul %47, %51, %cst_23 {dimension_numbers = #tpu.dot_dimension_numbers<[1], [0], [0], [1], [0, 0, 1, 1], [], []>} : vector<32x128xbf16>, vector<128x128xbf16>, vector<32x128xf32> -> vector<32x128xf32>
        %53 = arith.truncf %52 : vector<32x128xf32> to vector<32x128xbf16>
        %c1_i32_24 = arith.constant 1 : i32
        %54 = arith.subi %c1_i32_24, %22 : i32
        %55 = arith.index_cast %54 : i32 to index
        %56 = arith.index_cast %1 : i32 to index
        %c0_25 = arith.constant 0 : index
        %57 = vector.load %arg8[%55, %56, %c0_25] : memref<2x64x128xbf16, #tpu.memory_space<vmem>>, vector<1x32x128xbf16>
        %58 = vector.shape_cast %57 : vector<1x32x128xbf16> to vector<32x128xbf16>
        %59 = vector.shape_cast %53 : vector<32x128xbf16> to vector<1x32x128xbf16>
        tpu.vector_store %arg8[%55, %56, %c0_25], %59 {strides = array<i32>} : memref<2x64x128xbf16, #tpu.memory_space<vmem>>, vector<1x32x128xbf16>,
      } else {
      }
      %c1_i32_16 = arith.constant 1 : i32
      %37 = arith.cmpi eq, %arg0, %c1_i32_16 : i32
      %38 = arith.extui %37 : i1 to i32
      %c0_i32_17 = arith.constant 0 : i32
      %39 = arith.cmpi ne, %38, %c0_i32_17 : i32
      scf.if %39 {
        %40 = arith.index_cast %1 : i32 to index
        %c0_18 = arith.constant 0 : index
        %41 = vector.load %arg7[%40, %c0_18] : memref<64x128xf32, #tpu.memory_space<vmem>>, vector<32x128xf32>
        tpu.vector_store %arg7[%40, %c0_18], %33 {strides = array<i32>} : memref<64x128xf32, #tpu.memory_space<vmem>>, vector<32x128xf32>,
      } else {
      }
    } else {
    }
    %c2_i32_3 = arith.constant 2 : i32
    %10 = arith.cmpi eq, %arg0, %c2_i32_3 : i32
    %11 = arith.extui %10 : i1 to i32
    %c0_i32_4 = arith.constant 0 : i32
    %12 = arith.cmpi ne, %11, %c0_i32_4 : i32
    scf.if %12 {
      %c0_i32_5 = arith.constant 0 : i32
      %13 = arith.cmpi eq, %arg1, %c0_i32_5 : i32
      %14 = arith.extui %13 : i1 to i32
      %c0_i32_6 = arith.constant 0 : i32
      %15 = arith.cmpi ne, %14, %c0_i32_6 : i32
      scf.if %15 {
        %c0_13 = arith.constant 0 : index
        %c0_14 = arith.constant 0 : index
        %25 = vector.load %arg7[%c0_13, %c0_14] : memref<64x128xf32, #tpu.memory_space<vmem>>, vector<64x128xf32>
        %26 = tpu.iota {dimensions = array<i32: 0>} : vector<64x128xi32>
        %c48_i32 = arith.constant 48 : i32
        %27 = vector.broadcast %c48_i32 : i32 to vector<64x128xi32>
        %28 = arith.cmpi slt, %26, %27 : vector<64x128xi32>
        %29 = arith.extui %28 : vector<64x128xi1> to vector<64x128xi32>
        %30 = arith.sitofp %29 : vector<64x128xi32> to vector<64x128xf32>
        %31 = arith.mulf %25, %30 : vector<64x128xf32>
        %cst = arith.constant dense<0.000000e+00> : vector<128xf32>
        %32 = vector.multi_reduction <add>, %31, %cst [0] : vector<64x128xf32> to vector<128xf32>
        %33 = vector.shape_cast %32 : vector<128xf32> to vector<1x128xf32>
        %cst_15 = arith.constant 0.020833334 : f32
        %34 = vector.broadcast %cst_15 : f32 to vector<1x128xf32>
        %35 = arith.mulf %33, %34 : vector<1x128xf32>
        %36 = vector.broadcast %35 : vector<1x128xf32> to vector<64x128xf32>
        %37 = arith.subf %25, %36 : vector<64x128xf32>
        %38 = arith.mulf %37, %30 : vector<64x128xf32>
        %39 = arith.mulf %38, %38 : vector<64x128xf32>
        %cst_16 = arith.constant dense<0.000000e+00> : vector<128xf32>
        %40 = vector.multi_reduction <add>, %39, %cst_16 [0] : vector<64x128xf32> to vector<128xf32>
        %41 = vector.shape_cast %40 : vector<128xf32> to vector<1x128xf32>
        %cst_17 = arith.constant 0.0212765951 : f32
        %42 = vector.broadcast %cst_17 : f32 to vector<1x128xf32>
        %43 = arith.mulf %41, %42 : vector<1x128xf32>
        %c0_18 = arith.constant 0 : index
        %c0_19 = arith.constant 0 : index
        %44 = vector.load %arg9[%c0_18, %c0_19] : memref<1x128xf32, #tpu.memory_space<vmem>>, vector<1x128xf32>
        tpu.vector_store %arg9[%c0_18, %c0_19], %35 {strides = array<i32>} : memref<1x128xf32, #tpu.memory_space<vmem>>, vector<1x128xf32>,
        %45 = math.rsqrt %43 : vector<1x128xf32>
        %c0_20 = arith.constant 0 : index
        %c0_21 = arith.constant 0 : index
        %46 = vector.load %arg10[%c0_20, %c0_21] : memref<1x128xf32, #tpu.memory_space<vmem>>, vector<1x128xf32>
        tpu.vector_store %arg10[%c0_20, %c0_21], %45 {strides = array<i32>} : memref<1x128xf32, #tpu.memory_space<vmem>>, vector<1x128xf32>,
      } else {
      }
      %16 = arith.index_cast %1 : i32 to index
      %c0 = arith.constant 0 : index
      %17 = vector.load %arg7[%16, %c0] : memref<64x128xf32, #tpu.memory_space<vmem>>, vector<32x128xf32>
      %c0_7 = arith.constant 0 : index
      %c0_8 = arith.constant 0 : index
      %18 = vector.load %arg9[%c0_7, %c0_8] : memref<1x128xf32, #tpu.memory_space<vmem>>, vector<1x128xf32>
      %19 = vector.broadcast %18 : vector<1x128xf32> to vector<32x128xf32>
      %20 = arith.subf %17, %19 : vector<32x128xf32>
      %c0_9 = arith.constant 0 : index
      %c0_10 = arith.constant 0 : index
      %21 = vector.load %arg10[%c0_9, %c0_10] : memref<1x128xf32, #tpu.memory_space<vmem>>, vector<1x128xf32>
      %22 = vector.broadcast %21 : vector<1x128xf32> to vector<32x128xf32>
      %23 = arith.mulf %20, %22 : vector<32x128xf32>
      %c0_11 = arith.constant 0 : index
      %c0_12 = arith.constant 0 : index
      %24 = vector.load %arg6[%c0_11, %c0_12] : memref<32x128xf32, #tpu.memory_space<vmem>>, vector<32x128xf32>
      tpu.vector_store %arg6[%c0_11, %c0_12], %23 {strides = array<i32>} : memref<32x128xf32, #tpu.memory_space<vmem>>, vector<32x128xf32>,
    } else {
    }
    return
  }
  func.func @transform_1(%arg0: i32, %arg1: i32) -> (i32, i32) {
    %c0_i32 = arith.constant 0 : i32
    %c0_i32_0 = arith.constant 0 : i32
    %c0_i32_1 = arith.constant 0 : i32
    return %c0_i32, %c0_i32_0 : i32, i32
  }
  func.func @transform_2(%arg0: i32, %arg1: i32) -> (i32, i32, i32) {
    %c0_i32 = arith.constant 0 : i32
    %c0_i32_0 = arith.constant 0 : i32
    %c0_i32_1 = arith.constant 0 : i32
    %c0_i32_2 = arith.constant 0 : i32
    return %c0_i32, %c0_i32_0, %c0_i32_1 : i32, i32, i32
  }
  func.func @transform_3(%arg0: i32, %arg1: i32) -> (i32, i32, i32) {
    %c0_i32 = arith.constant 0 : i32
    %c0_i32_0 = arith.constant 0 : i32
    %c0_i32_1 = arith.constant 0 : i32
    %c0_i32_2 = arith.constant 0 : i32
    return %c0_i32, %c0_i32_0, %c0_i32_1 : i32, i32, i32
  }
  func.func @transform_4(%arg0: i32, %arg1: i32) -> (i32, i32) {
    %c2_i32 = arith.constant 2 : i32
    %0 = arith.cmpi eq, %arg0, %c2_i32 : i32
    %c0_i32 = arith.constant 0 : i32
    %1 = arith.select %0, %arg1, %c0_i32 : i32
    %c0_i32_0 = arith.constant 0 : i32
    %c0_i32_1 = arith.constant 0 : i32
    return %1, %c0_i32_0 : i32, i32
  }
}

</mosaic_0001>

<bundles_post_ra>
// kernel: tpu_custom_call.1
= control target key start
LH: loop header
LB: loop body
LE: loop exit
PB: predicated region body
PF: predicated region fallthrough
CT: control target
= control target key end

     0   :  { %9 = vsyncpa [#allocation9], 0  ;;  %s1730_s0 = inlined_call_operand.hbm [shape: bf16[64,64], index: 0, kind: input, shape index: {}]   ;;  %s1731_s1 = inlined_call_operand.hbm [shape: bf16[64,128], index: 1, kind: input, shape index: {}]   ;;  %s1732_s2 = inlined_call_operand.hbm [shape: bf16[2,128,128], index: 2, kind: input, shape index: {}]   ;;  %s1733_s3 = inlined_call_operand.vmem [shape: f32[2,1,128], index: 3, kind: input, shape index: {}]   ;;  %s1734_s4 = inlined_call_operand.hbm [shape: f32[64,128], index: 4, kind: output, shape index: {}]  }
   0x1   :  { %10 = vsyncpa [#allocation12], 0 }
   0x2   :  { %11 = vsyncpa [#allocation10], 0 }
   0x3   :  { %13 = vsyncpa [#allocation10 + $0x1], 0  ;;  %s1448_s15 = smov 0   ;;  %s1450_s16 = smov 0  }
   0x4   :  { %s1452_s17 = smov 0   ;;  %s1454_s18 = smov 0  }
   0x5   :  { %s1456_s19 = smov 0   ;;  %s1458_s20 = smov 0  }
   0x6   :  { %s1460_s21 = smov 0   ;;  %s1462_s22 = smov 0  }
   0x7 LB: > { %1742 = sst [smem:[#allocation22_spill]] %s1409_s21  ;;  %s919_s23 = sadd.s32 4294967295, %s1413_s22   ;;  %s1413_s22 = sphi %s1462_s22, %s19_s22   ;;  %s1409_s21 = sphi %s1460_s21, %s1756_s21   ;;  %s1405_s20 = sphi %s1458_s20, %s1761_s20   ;;  %s1401_s19 = sphi %s1456_s19, %s1754_s19   ;;  %s1397_s18 = sphi %s1454_s18, %s1760_s18   ;;  %s1393_s17 = sphi %s1452_s17, %s1759_s17   ;;  %s1389_s16 = sphi %s1450_s16, %s1758_s16   ;;  %s1385_s15 = sphi %s1448_s15, %s1757_s15  }
   0x8   : > { %s920_s24 = sadd.s32 4294967294, %s1413_s22   ;;  %s28_s25 = sadd.s32 1, %s1405_s20 }
   0x9   : > { %s31_s26 = sadd.s32 1, %s1409_s21  ;;  %p29_p0 = scmp.ge.s32.totalorder %s28_s25, 2 }
   0xa   : > { %p98_p1 = scmp.eq.s32.totalorder %s1409_s21, 2  ;;  %s105_s27 = sadd.s32 1, %s1393_s17 }
   0xb   : > { %p115_p2 = scmp.ne.s32.totalorder %s1393_s17, %s1389_s16  ;;  %s1763_s25 = smov (%p29_p0, %s28_s25), 0 }
   0xc   : > { %1743 = sst [smem:[#allocation23_spill]] %s1763_s25  ;;  %s1765_s26 = smov (!%p29_p0, %s31_s26), %s1409_s21 }
   0xd   : > { %s99_s28 = scalar_select %p98_p1, %s1405_s20, 0 }
   0xe   : > { %p33_p3 = scmp.ge.s32.totalorder %s1765_s26, 3  ;;  %p116_p4 = scmp.eq.s32.totalorder %s919_s23, 5 }
   0xf   : > { %p121_p5 = scmp.ne.s32.totalorder %s1389_s16, %s1385_s15  ;;  %p122_p6 = scmp.eq.s32.totalorder %s920_s24, 5 }
  0x10   : > { %s1767_s26 = smov (%p33_p3, %s1765_s26), 0  ;;  %p1504_p7 = por %p116_p4, %p115_p2 }
  0x11   : > { %1744 = sst [smem:[#allocation24_spill]] %s1767_s26  ;;  %p1508_p8 = por %p122_p6, %p121_p5 }
  0x12   : > { %s1745_s29 = scalar_select %p1504_p7, 1, 0 }
  0x13   : > { %s1746_s30 = scalar_select %p1508_p8, 1, 0 }
  0x14   : > { %p100_p9 = scmp.eq.s32.totalorder %s1767_s26, 2  ;;  %p921_p10 = scmp.ge.s32.totalorder %s1413_s22, 1 }
  0x15   : > { %p129_p11 = scmp.lt.s32.totalorder %s1413_s22, 7  ;;  %p1520_p13 = scmp.eq.s32.totalorder %s919_s23, 0 }
  0x16   : > { %s101_s5 = scalar_select %p100_p9, %s1763_s25, 0 }
  0x17   : > { %p1516_p12 = pnand %p921_p10, %p129_p11  ;;  %s1415_s9 = smov [#allocation8]  }
  0x18   : > { %s1748_s7 = scalar_select %p1520_p13, 1, 0 }
  0x19   : > { %s1747_s6 = scalar_select %p1516_p12, 1, 0 }
  0x1a   : > { %s102_s8 = ssub.s32 %s99_s28, %s101_s5  ;;  %p1106_p1 = pneg %p1516_p12 }
  0x1b   : > { %p103_p0 = scmp.eq.s32.totalorder %s102_s8, 0  ;;  %s141_s10 = sshll.u32 %s1415_s9, 4  ;;  %s142_s10 = int_to_ptr.vmem [resolvable:$true] %s141_s10 }
  0x1c   : > { %p1531_p2 = pnand %p1520_p13, %p1106_p1  ;;  %s1416_s13 = smov [#allocation11]  }
  0x1d   : > { %s1527_s11 = scalar_select %p103_p0, %s1393_s17, %s105_s27  }
  0x1e   : > { %s154_s14 = sshll.u32 %s1416_s13, 4  ;;  %s1231_s28 = scalar_lea.hbm %s1731_s1, 512  ;;  %s155_s14 = int_to_ptr.vmem [resolvable:$true] %s154_s14 }
  0x1f   : > { %p1232_p3 = scmp.ne.s32.totalorder %s1731_s1, %s1231_s28  ;;  %p1233_p4 = pneg %p1531_p2 }
  0x20   : > { %p1238_p9 = scmp.lt.u32.totalorder %s1231_s28, %s1731_s1 }
  0x21   : > { %p1234_p5 = pnand %p1233_p4, %p1232_p3 }
  0x23   : > { %p1235_p6 = pneg %p1234_p5 }
  0x25   : > { %p1240_p10 = pnand %p1238_p9, %p1235_p6 }
  0x27   : > { %1243 = shalt.err (!%p1240_p10)
}
  0x28   : > { %s1244_s13 = scalar_lea.vmem %s142_s10, 512  ;;  %p1252_p8 = scmp.lt.s32.totalorder %s142_s10, %s142_s10 }
  0x29   : > { %p1245_p11 = scmp.ne.s32.totalorder %s142_s10, %s1244_s13  ;;  %p1253_p7 = scmp.lt.s32.totalorder %s1244_s13, %s1244_s13 }
  0x2b   : > { %p1247_p0 = pnand %p1245_p11, %p1233_p4  ;;  %p1254_p13 = por %p1253_p7, %p1252_p8 }
  0x2d   : > { %p1248_p1 = pneg %p1247_p0 }
  0x2f   : > { %p1255_p12 = pnand %p1254_p13, %p1248_p1 }
  0x31   : > { %1258 = shalt.err (!%p1255_p12)
}
  0x32   : > { %s1417_s23 = smov 64   ;;  %s1418_s24 = smov 4  }
  0x33   : > { %1109 = dma.hbm_to_vmem [thread:$0]  (!%p1531_p2), %s1731_s1, 512, %s142_s10, [#allocation9], %s1417_s23, %s1417_s23, %s1418_s24  }
  0x34   : > { %s1259_s9 = scalar_lea.hbm %s1732_s2, 2048 }
  0x35   : > { %p1260_p7 = scmp.ne.s32.totalorder %s1732_s2, %s1259_s9  ;;  %p1266_p13 = scmp.lt.u32.totalorder %s1259_s9, %s1732_s2 }
  0x37   : > { %p1262_p8 = pnand %p1260_p7, %p1233_p4 }
  0x39   : > { %p1263_p12 = pneg %p1262_p8 }
  0x3b   : > { %p1268_p3 = pnand %p1266_p13, %p1263_p12 }
  0x3d   : > { %1271 = shalt.err (!%p1268_p3)
}
  0x3e   : > { %s1272_s10 = scalar_lea.vmem %s155_s14, 2048  ;;  %p1280_p10 = scmp.lt.s32.totalorder %s155_s14, %s155_s14 }
  0x3f   : > { %p1273_p5 = scmp.ne.s32.totalorder %s155_s14, %s1272_s10  ;;  %p1281_p11 = scmp.lt.s32.totalorder %s1272_s10, %s1272_s10 }
  0x41   : > { %p1275_p6 = pnand %p1273_p5, %p1233_p4  ;;  %p1282_p0 = por %p1281_p11, %p1280_p10 }
  0x43   : > { %p1276_p9 = pneg %p1275_p6 }
  0x45   : > { %p1283_p1 = pnand %p1282_p0, %p1276_p9 }
  0x47   : > { %1286 = shalt.err (!%p1283_p1)
}
  0x48   : > { %1112 = dma.hbm_to_vmem [thread:$0]  (!%p1531_p2), %s1732_s2, 2048, %s155_s14, [#allocation12], %s1417_s23, %s1417_s23, %s1418_s24  }
  0x49   : > { %p1750_p7 = scmp.ne.s32.totalorder %s1747_s6, 0 }
  0x4a   : > { %p1751_p8 = scmp.ne.s32.totalorder (!%p1750_p7), %s1748_s7, 0 }
  0x4b   : > { %173 = sbr.rel (%p1750_p7) target bundleno = 969 (0x3c9), region = 32 }
  0x52   : > { %1370 = dma.done.wait (%p1751_p8), [#allocation9], 512  }
  0x53   : > { %1372 = vsyncadd (%p1751_p8), [#allocation9], 4294966784 }
  0x54   : > { %1374 = dma.done.wait (%p1751_p8), [#allocation12], 2048  }
  0x55   : > { %1376 = vsyncadd (%p1751_p8), [#allocation12], 4294965248  ;;  %s193_s21 = sand.u32 1, %s1389_s16   ;;  %s1589_s6 = sshll.u32 %s1397_s18, 5 }
  0x56   : > { %s927_s12 = sshll.u32 %s193_s21, 5  ;;  %p201_p2 = scmp.eq.s32.totalorder %s1401_s19, 0 }
  0x57   : > { %p202_p4 = scmp.eq.s32.totalorder %s1397_s18, 0  ;;  %s1595_s14 = scalar_lea.vmem [#allocation13], %s927_s12 }
  0x59   : > { %p203_p12 = pnand %p202_p4, %p201_p2 }
  0x5a   : > { %v1193_v0 = vld [vmem:[#allocation11] sm:$0xff] (!%p203_p12)   ;;  %v1194_v1 = vld [vmem:[#allocation11 + $0x8] sm:$0xff] (!%p203_p12)   ;;  %v1195_v2 = vld [vmem:[#allocation11 + $0x10] sm:$0xff] (!%p203_p12)   ;;  %s1419_s7 = smov (!%p203_p12), [#allocation6]   ;;  %s1287_s5 = scalar_lea.hbm (!%p203_p12), %s1730_s0, 512 }
  0x5b   : > { %206 = sbr.rel (%p203_p12) target bundleno = 343 (0x157), region = 44  ;;  %1024 = vmatprep.subr.bf16.mxu0 (!%p203_p12), %v1193_v0  ;;  %1080 = vmatprep.subr.bf16.mxu1 (!%p203_p12), %v1193_v0  ;;  %v1196_v3 = vld [vmem:[#allocation11 + $0x18] sm:$0xff] (!%p203_p12)   ;;  %v1201_v4 = vld [vmem:[#allocation8] sm:$0xff] (!%p203_p12)   ;;  %v1202_v5 = vld [vmem:[#allocation8 + $0x10] sm:$0xff] (!%p203_p12)   ;;  %s214_s23 = sshll.u32 (!%p203_p12), %s1419_s7, 4  ;;  %s215_s23 = int_to_ptr.vmem [resolvable:$true] %s214_s23 }
  0x5c   : > { %1025 = vmatpush3.bf16.msra.mxu0 (!%p203_p12), %v1193_v0  ;;  %1088 = vmatpush3.bf16.msra.mxu1 (!%p203_p12), %v1193_v0  ;;  %v1197_v6 = vld [vmem:[#allocation11 + $0x20] sm:$0xff] (!%p203_p12)   ;;  %v1198_v7 = vld [vmem:[#allocation11 + $0x28] sm:$0xff] (!%p203_p12)   ;;  %v1199_v8 = vld [vmem:[#allocation11 + $0x30] sm:$0xff] (!%p203_p12)   ;;  %p1288_p13 = scmp.ne.s32.totalorder (!%p203_p12), %s1730_s0, %s1287_s5  ;;  %p1291_p3 = scmp.lt.u32.totalorder (!%p203_p12), %s1287_s5, %s1730_s0 }
  0x5d   : > { %1026 = vmatprep.subr.bf16.mxu0 (!%p203_p12), %v1194_v1  ;;  %1081 = vmatprep.subr.bf16.mxu1 (!%p203_p12), %v1194_v1  ;;  %v1200_v9 = vld [vmem:[#allocation11 + $0x38] sm:$0xff] (!%p203_p12)   ;;  %v1203_v10 = vld [vmem:[#allocation8 + $0x8] sm:$0xff] (!%p203_p12)  }
  0x5e   : > { %1040 = vmatprep.mubr.bf16.mxu0 (!%p203_p12), %v1201_v4  ;;  %1044 = vmatprep.mubr.bf16.mxu1 (!%p203_p12), %v1202_v5  ;;  %v1204_v11 = vld [vmem:[#allocation8 + $0x18] sm:$0xff] (!%p203_p12)   ;;  %p1293_p5 = pnand (!%p203_p12), %p1291_p3, %p1288_p13 }
  0x60   : > { %1027 = vmatpush3.bf16.msra.mxu0 (!%p203_p12), %v1194_v1  ;;  %1089 = vmatpush3.bf16.msra.mxu1 (!%p203_p12), %v1194_v1 }
  0x61   : > { %1028 = vmatprep.subr.bf16.mxu0 (!%p203_p12), %v1195_v2  ;;  %1082 = vmatprep.subr.bf16.mxu1 (!%p203_p12), %v1195_v2 }
  0x64   : > { %1029 = vmatpush3.bf16.msra.mxu0 %v1195_v2  ;;  %1090 = vmatpush3.bf16.msra.mxu1 %v1195_v2 }
  0x65   : > { %1030 = vmatprep.subr.bf16.mxu0 %v1196_v3  ;;  %1083 = vmatprep.subr.bf16.mxu1 %v1196_v3 }
  0x68   : > { %1031 = vmatpush3.bf16.msra.mxu0 %v1196_v3  ;;  %1091 = vmatpush3.bf16.msra.mxu1 %v1196_v3 }
  0x69   : > { %1032 = vmatprep.subr.bf16.mxu0 %v1197_v6  ;;  %1084 = vmatprep.subr.bf16.mxu1 %v1197_v6 }
  0x6c   : > { %1033 = vmatpush3.bf16.msra.mxu0 %v1197_v6  ;;  %1092 = vmatpush3.bf16.msra.mxu1 %v1197_v6 }
  0x6d   : > { %1034 = vmatprep.subr.bf16.mxu0 %v1198_v7  ;;  %1085 = vmatprep.subr.bf16.mxu1 %v1198_v7 }
  0x70   : > { %1035 = vmatpush3.bf16.msra.mxu0 %v1198_v7  ;;  %1093 = vmatpush3.bf16.msra.mxu1 %v1198_v7 }
  0x71   : > { %1036 = vmatprep.subr.bf16.mxu0 %v1199_v8  ;;  %1086 = vmatprep.subr.bf16.mxu1 %v1199_v8 }
  0x74   : > { %1037 = vmatpush3.bf16.msra.mxu0 %v1199_v8  ;;  %1094 = vmatpush3.bf16.msra.mxu1 %v1199_v8 }
  0x75   : > { %1038 = vmatprep.subr.bf16.mxu0 %v1200_v9  ;;  %1087 = vmatprep.subr.bf16.mxu1 %v1200_v9 }
  0x78   : > { %1039 = vmatpush3.bf16.msra.mxu0 %v1200_v9  ;;  %1095 = vmatpush3.bf16.msra.mxu1 %v1200_v9 }
  0x7b   : > { %1041 = vmatmul.mubr.bf16.vlgmr.msra.gmra.mrb[0].mxu0 %v1203_v10  ;;  %1045 = vmatmul.mubr.bf16.vlgmr.msra.gmra.mrb[0].mxu1 %v1204_v11 }
  0x7c   : > { %1296 = shalt.err (!%p1293_p5)  }
  0x7d   : > { %s1297_s10 = scalar_lea.vmem %s215_s23, 512  ;;  %p1302_p9 = scmp.lt.s32.totalorder %s215_s23, %s215_s23 }
  0x7e   : > { %p1298_p6 = scmp.ne.s32.totalorder %s215_s23, %s1297_s10  ;;  %p1303_p10 = scmp.lt.s32.totalorder %s1297_s10, %s1297_s10 }
  0x80   : > { %p1304_p11 = por %p1303_p10, %p1302_p9 }
  0x82   : > { %p1305_p0 = pnand %p1304_p11, %p1298_p6 }
  0x84   : > { %1308 = shalt.err (!%p1305_p0)  }
  0x85   : > { %217 = dma.hbm_to_vmem [thread:$0]  %s1730_s0, 512, %s215_s23, [#allocation7] }
 0x14e   : > { %v1042_v12 = vpop.f32.mrb[0].mxu0  ;;  %v1046_v13 = vpop.f32.mrb[0].mxu1 }
 0x14f   : > { %v348_v14 = vpop.f32.mrb[1].mxu0  ;;  %v364_v15 = vpop.f32.mrb[1].mxu1 }
 0x150   : > { %v1043_v16 = vpop.f32.mrb[2].mxu0  ;;  %v1047_v17 = vpop.f32.mrb[2].mxu1 }
 0x151   : > { %v380_v18 = vpack.c.bf16 %v1043_v16, %v1042_v12  ;;  %v382_v19 = vpack.c.bf16 %v1047_v17, %v1046_v13  ;;  %v351_v20 = vpop.f32.mrb[3].mxu0  ;;  %v367_v21 = vpop.f32.mrb[3].mxu1 }
 0x152   : > { %v379_v22 = vpack.c.bf16 %v351_v20, %v348_v14  ;;  %v381_v23 = vpack.c.bf16 %v367_v21, %v364_v15 }
 0x153   : > { %384 = vst [vmem:[#allocation3 + $0x8] sm:$0xff] %v380_v18  ;;  %386 = vst [vmem:[#allocation3 + $0x18] sm:$0xff] %v382_v19 }
 0x154   : > { %383 = vst [vmem:[#allocation3] sm:$0xff] %v379_v22  ;;  %385 = vst [vmem:[#allocation3 + $0x10] sm:$0xff] %v381_v23 }
 0x155   : > { %1377 = dma.done.wait [#allocation7], 512 }
 0x156   : > { %1378 = vsyncadd [#allocation7], 4294966784 }
 0x157 PF: > { %p941_p1 = scmp.ge.s32.totalorder %s1401_s19, 2 }
 0x158   : > { %p395_p7 = scmp.lt.s32.totalorder (!%p941_p1), %s1401_s19, 0  ;;  %s396_s12 = ssub.s32 (!%p941_p1), 0, %s1401_s19  ;;  %vm428_vm0 = vcmask (!%p941_p1), 523264  }
 0x159   : > { %394 = sbr.rel (%p941_p1) target bundleno = 849 (0x351), region = 52  ;;  %s942_s7 = smin.u32 (!%p941_p1), %s1401_s19, %s396_s12 }
 0x15a   : > { %s407_s23 = sshra.s32 (!%p941_p1), %s1589_s6, 4  ;;  %s398_s24 = sand.u32 (!%p941_p1), 1, %s942_s7  }
 0x15b   : > { %s945_s28 = sshll.u32 (!%p941_p1), %s407_s23, 3  ;;  %s399_s5 = ssub.s32 (!%p941_p1), 0, %s398_s24 }
 0x15c   : > { %s410_s8 = scalar_lea.vmem (!%p941_p1), [#allocation6], %s945_s28  ;;  %s420_s26 = scalar_lea.vmem (!%p941_p1), %s1733_s3, %s1401_s19 }
 0x15d   : > { %v411_v24 = vld [vmem:[%s410_s8] sm:$0xff] (!%p941_p1)  ;;  %v412_v29 = vld [vmem:[%s410_s8 + $0x8] sm:$0xff] (!%p941_p1)  ;;  %p951_p2 = scmp.ge.s32.totalorder (!%p941_p1), %s1401_s19, 1 }
 0x15e   : > { %1056 = vmatprep.mubr.msk.bf16.mxu0 (!%p941_p1), %vm428_vm0, %v411_v24  ;;  %v948_v30 = vld [vmem:[%s420_s26] ss:$0 sm:$0xff] (!%p941_p1) }
 0x160   : > { %s1769_s5 = smov (!%p395_p7, %s399_s5), %s398_s24  ;;  %s956_s12 = sshll.u32 (!%p951_p2), %s1401_s19, 6 }
 0x161   : > { %p944_p8 = scmp.lt.s32.totalorder %s1769_s5, 0  ;;  %s405_s27 = sadd.s32 2, %s1769_s5 }
 0x162   : > { %s1639_s7 = scalar_lea.vmem (!%p951_p2), [#allocation11], %s956_s12  ;;  %s512_s24 = scalar_lea.vmem (!%p951_p2), [#allocation2], %s1589_s6 }
 0x163   : > { %s1771_s27 = smov (!%p944_p8, %s405_s27), %s1769_s5  ;;  %v1205_v43 = vld [vmem:[%s1639_s7 + $0x40] sm:$0xff] (!%p951_p2)   ;;  %v1206_v44 = vld [vmem:[%s1639_s7 + $0x48] sm:$0xff] (!%p951_p2)   ;;  %v1207_v45 = vld [vmem:[%s1639_s7 + $0x50] sm:$0xff] (!%p951_p2)  }
 0x164   : > { %s994_s9 = sshll.u32 %s1771_s27, 5  ;;  %v1208_v46 = vld [vmem:[%s1639_s7 + $0x58] sm:$0xff] (!%p951_p2)   ;;  %v1209_v51 = vld [vmem:[%s1639_s7 + $0x60] sm:$0xff] (!%p951_p2)   ;;  %v1210_v56 = vld [vmem:[%s1639_s7 + $0x68] sm:$0xff] (!%p951_p2)   ;;  %s638_s28 = ssub.s32 (!%p951_p2), 1, %s1771_s27 }
 0x165   : > { %s415_s13 = scalar_lea.vmem [#allocation3], %s994_s9  ;;  %v1211_v57 = vld [vmem:[%s1639_s7 + $0x70] sm:$0xff] (!%p951_p2)   ;;  %v1212_v60 = vld [vmem:[%s1639_s7 + $0x78] sm:$0xff] (!%p951_p2)   ;;  %s981_s5 = sshll.u32 (!%p951_p2), %s638_s28, 2 }
 0x166   : > { %v416_v25 = vld [vmem:[%s415_s13] sm:$0xff]  ;;  %v417_v26 = vld [vmem:[%s415_s13 + $0x8] sm:$0xff]  ;;  %v418_v27 = vld [vmem:[%s415_s13 + $0x10] sm:$0xff]  ;;  %s640_s8 = sadd.s32 (!%p951_p2), %s981_s5, %s407_s23 }
 0x167   : > { %1048 = vmatprep.subr.bf16.mxu0 %v416_v25  ;;  %v419_v28 = vld [vmem:[%s415_s13 + $0x18] sm:$0xff]  ;;  %s982_s9 = sshll.u32 (!%p951_p2), %s640_s8, 3 }
 0x168   : > { %1049 = vmatpush3.bf16.msra.mxu0 %v416_v25  ;;  %s642_s13 = scalar_lea.vmem (!%p951_p2), [#allocation3], %s982_s9 }
 0x169   : > { %1050 = vmatprep.subr.bf16.mxu0 %v417_v26 }
 0x16c   : > { %1051 = vmatpush3.bf16.msra.mxu0 %v417_v26 }
 0x16d   : > { %1052 = vmatprep.subr.bf16.mxu0 %v418_v27 }
 0x170   : > { %1053 = vmatpush3.bf16.msra.mxu0 %v418_v27 }
 0x171   : > { %1054 = vmatprep.subr.bf16.mxu0 %v419_v28 }
 0x174   : > { %1055 = vmatpush3.bf16.msra.mxu0 %v419_v28 }
 0x175   : > { %1060 = vmatprep.subr.bf16.mxu0 (!%p951_p2), %v1205_v43 }
 0x177   : > { %1057 = vmatmul.mubr.msk.bf16.vlgmr.msra.gmra.mrb[0].mxu0 %vm428_vm0, %v412_v29 }
 0x178   : > { %1061 = vmatpush3.bf16.msra.mxu0 (!%p951_p2), %v1205_v43 }
 0x179   : > { %1062 = vmatprep.subr.bf16.mxu0 (!%p951_p2), %v1206_v44 }
 0x17c   : > { %1063 = vmatpush3.bf16.msra.mxu0 (!%p951_p2), %v1206_v44 }
 0x17d   : > { %1064 = vmatprep.subr.bf16.mxu0 (!%p951_p2), %v1207_v45 }
 0x180   : > { %1065 = vmatpush3.bf16.msra.mxu0 (!%p951_p2), %v1207_v45 }
 0x181   : > { %1066 = vmatprep.subr.bf16.mxu0 (!%p951_p2), %v1208_v46 }
 0x184   : > { %1067 = vmatpush3.bf16.msra.mxu0 (!%p951_p2), %v1208_v46 }
 0x185   : > { %1068 = vmatprep.subr.bf16.mxu0 (!%p951_p2), %v1209_v51 }
 0x188   : > { %1069 = vmatpush3.bf16.msra.mxu0 (!%p951_p2), %v1209_v51 }
 0x189   : > { %1070 = vmatprep.subr.bf16.mxu0 (!%p951_p2), %v1210_v56 }
 0x18c   : > { %1071 = vmatpush3.bf16.msra.mxu0 (!%p951_p2), %v1210_v56 }
 0x18d   : > { %1072 = vmatprep.subr.bf16.mxu0 (!%p951_p2), %v1211_v57 }
 0x190   : > { %1073 = vmatpush3.bf16.msra.mxu0 (!%p951_p2), %v1211_v57 }
 0x191   : > { %1074 = vmatprep.subr.bf16.mxu0 (!%p951_p2), %v1212_v60 }
 0x194   : > { %1075 = vmatpush3.bf16.msra.mxu0 (!%p951_p2), %v1212_v60 }
 0x248   : > { %487 = sbr.rel (%p951_p2) target bundleno = 840 (0x348), region = 56 }
 0x24a   : > { %v1058_v31 = vpop.f32.mrb[0].mxu0 }
 0x24b   : > { %v1625_v32 = vadd.f32 %v1058_v31, %v948_v30  ;;  %v469_v33 = vpop.f32.mrb[1].mxu0 }
 0x24c   : > { %v1627_v34 = vadd.f32 %v948_v30, %v469_v33  ;;  %v1059_v35 = vpop.f32.mrb[2].mxu0 }
 0x24d   : > { %v1629_v36 = vadd.f32 %v1059_v35, %v948_v30  ;;  %v472_v37 = vpop.f32.mrb[3].mxu0  ;;  %v954_v41 = vmul.f32 (!%p951_p2), -1.442695, %v1625_v32 }
 0x24e   : > { %v1631_v38 = vadd.f32 %v948_v30, %v472_v37  ;;  %v952_v39 = vmul.f32 (!%p951_p2), -1.442695, %v1627_v34 }
 0x24f   : > { %v955_v42 = vmul.f32 -1.442695, %v1629_v36 }
 0x250   : > { %v953_v40 = vmul.f32 -1.442695, %v1631_v38  ;;  %1213 = vpow2.f32 %v952_v39 }
 0x252   : > { %1215 = vpow2.f32 %v953_v40 }
 0x253   : > { %1217 = vpow2.f32 %v954_v41 }
 0x254   : > { %1219 = vpow2.f32 %v955_v42 }
 0x25a   : > { %v1214_v47 = vpop.eup %1213 }
 0x25b   : > { %v500_v49 = vadd.f32 1.0, %v1214_v47 }
 0x25c   : > { %v1216_v48 = vpop.eup %1215 }
 0x25d   : > { %v1218_v50 = vpop.eup %1217  ;;  %v501_v52 = vadd.f32 1.0, %v1216_v48  ;;  %1221 = vrcp.f32 %v500_v49 }
 0x25e   : > { %v1220_v53 = vpop.eup %1219  ;;  %v502_v54 = vadd.f32 1.0, %v1218_v50 }
 0x25f   : > { %1223 = vrcp.f32 %v501_v52  ;;  %v503_v55 = vadd.f32 1.0, %v1220_v53 }
 0x260   : > { %1225 = vrcp.f32 %v502_v54 }
 0x261   : > { %1227 = vrcp.f32 %v503_v55 }
 0x267   : > { %v1222_v58 = vpop.eup %1221 }
 0x268   : > { %513 = vst [vmem:[%s512_s24] sm:$0xff] %v1222_v58 }
 0x269   : > { %v1224_v59 = vpop.eup %1223 }
 0x26a   : > { %v1226_v61 = vpop.eup %1225  ;;  %514 = vst [vmem:[%s512_s24 + $0x8] sm:$0xff] %v1224_v59  ;;  %v517_v62 = vpack.c.bf16 %v1224_v59, %v1222_v58 }
 0x26b   : > { %v1228_v63 = vpop.eup %1227  ;;  %515 = vst [vmem:[%s512_s24 + $0x10] sm:$0xff] %v1226_v61 }
 0x26c   : > { %1076 = vmatprep.mubr.bf16.mxu0 %v517_v62  ;;  %516 = vst [vmem:[%s512_s24 + $0x18] sm:$0xff] %v1228_v63  ;;  %v518_v0 = vpack.c.bf16 %v1228_v63, %v1226_v61 }
 0x26e   : > { %1077 = vmatmul.mubr.bf16.vlgmr.msra.gmra.mrb[0].mxu0 %v518_v0 }
 0x341   : > { %v1078_v1 = vpop.f32.mrb[0].mxu0 }
 0x342   : > { %v621_v2 = vpop.f32.mrb[1].mxu0 }
 0x343   : > { %v1079_v3 = vpop.f32.mrb[2].mxu0 }
 0x344   : > { %v637_v4 = vpack.c.bf16 %v1079_v3, %v1078_v1  ;;  %v624_v5 = vpop.f32.mrb[3].mxu0 }
 0x345   : > { %v636_v6 = vpack.c.bf16 %v624_v5, %v621_v2 }
 0x346   : > { %644 = vst [vmem:[%s642_s13 + $0x8] sm:$0xff] %v637_v4 }
 0x347   : > { %643 = vst [vmem:[%s642_s13] sm:$0xff] %v636_v6 }
 0x348 PF: > { %p983_p4 = scmp.ne.s32.totalorder %s1401_s19, 1 }
 0x349   : > { %s649_s10 = scalar_lea.vmem (!%p983_p4), [#allocation2], %s1589_s6 }
 0x34a   : > { %648 = sbr.rel (%p983_p4) target bundleno = 849 (0x351), region = 60  ;;  %650 = vst [vmem:[%s649_s10] sm:$0xff] (!%p983_p4), %v1627_v34  ;;  %651 = vst [vmem:[%s649_s10 + $0x8] sm:$0xff] (!%p983_p4), %v1631_v38 }
 0x34b   : > { %652 = vst [vmem:[%s649_s10 + $0x10] sm:$0xff] (!%p983_p4), %v1625_v32  ;;  %653 = vst [vmem:[%s649_s10 + $0x18] sm:$0xff] (!%p983_p4), %v1629_v36 }
 0x351 PF: > { %p984_p12 = scmp.ne.s32.totalorder %s1401_s19, 2 }
 0x352   : > { %p985_p13 = scmp.ne.s32.totalorder (!%p984_p12), %s1397_s18, 0 }
 0x353   : > { %657 = sbr.rel (%p984_p12) target bundleno = 942 (0x3ae), region = 64 }
 0x35a   : > { %660 = sbr.rel (%p985_p13) target bundleno = 931 (0x3a3), region = 68  ;;  %v661_v7 = vld [vmem:[#allocation2] sm:$0xff] (!%p985_p13)  ;;  %v662_v8 = vld [vmem:[#allocation2 + $0x8] sm:$0xff] (!%p985_p13)  ;;  %v663_v9 = vld [vmem:[#allocation2 + $0x10] sm:$0xff] (!%p985_p13) }
 0x35b   : > { %v710_v10 = vadd.f32 (!%p985_p13), %v662_v8, %v661_v7  ;;  %v664_v11 = vld [vmem:[#allocation2 + $0x18] sm:$0xff] (!%p985_p13)  ;;  %v665_v13 = vld [vmem:[#allocation2 + $0x20] sm:$0xff] (!%p985_p13)  ;;  %v667_v14 = vld [vmem:[#allocation2 + $0x30] sm:$0xff] (!%p985_p13) }
 0x35c   : > { %v666_v16 = vld [vmem:[#allocation2 + $0x28] sm:$0xff] (!%p985_p13)  ;;  %v668_v17 = vld [vmem:[#allocation2 + $0x38] sm:$0xff] (!%p985_p13)  ;;  %v708_v18 = vmul.f32 (!%p985_p13), 0.0, %v667_v14 }
 0x35d   : > { %v711_v12 = vadd.f32 (!%p985_p13), %v710_v10, %v663_v9  ;;  %v709_v20 = vmul.f32 (!%p985_p13), 0.0, %v668_v17 }
 0x35f   : > { %v712_v15 = vadd.f32 (!%p985_p13), %v711_v12, %v664_v11 }
 0x361   : > { %v713_v19 = vadd.f32 %v712_v15, %v665_v13 }
 0x363   : > { %v714_v21 = vadd.f32 %v713_v19, %v666_v16 }
 0x365   : > { %v715_v22 = vadd.f32 %v714_v21, %v708_v18 }
 0x367   : > { %v716_v23 = vadd.f32 %v715_v22, %v709_v20 }
 0x369   : > { %v717_v24 = vrot.slane %v716_v23, 4 }
 0x36b   : > { %v718_v25 = vadd.f32 %v717_v24, %v716_v23 }
 0x36d   : > { %v719_v26 = vrot.slane %v718_v25, 2 }
 0x36f   : > { %v720_v27 = vadd.f32 %v719_v26, %v718_v25 }
 0x371   : > { %v721_v28 = vrot.slane %v720_v27, 1 }
 0x373   : > { %v722_v29 = vadd.f32 %v721_v28, %v720_v27 }
 0x375   : > { %v723_v30 = vmul.f32 0.020833334, %v722_v29 }
 0x377   : > { %762 = vst [vmem:[#allocation4] sm:$0x1] %v723_v30  ;;  %v724_v31 = vsub.f32 %v661_v7, %v723_v30  ;;  %v725_v32 = vsub.f32 %v662_v8, %v723_v30  ;;  %v726_v33 = vsub.f32 %v663_v9, %v723_v30  ;;  %v727_v34 = vsub.f32 %v664_v11, %v723_v30 }
 0x378   : > { %v728_v35 = vsub.f32 %v665_v13, %v723_v30  ;;  %v730_v36 = vsub.f32 %v667_v14, %v723_v30  ;;  %v729_v40 = vsub.f32 %v666_v16, %v723_v30  ;;  %v731_v41 = vsub.f32 %v668_v17, %v723_v30 }
 0x379   : > { %v740_v37 = vmul.f32 %v724_v31, %v724_v31  ;;  %v741_v38 = vmul.f32 %v725_v32, %v725_v32  ;;  %v742_v39 = vmul.f32 %v726_v33, %v726_v33  ;;  %v743_v42 = vmul.f32 %v727_v34, %v727_v34 }
 0x37a   : > { %v738_v44 = vmul.f32 0.0, %v730_v36  ;;  %v744_v45 = vmul.f32 %v728_v35, %v728_v35  ;;  %v739_v47 = vmul.f32 0.0, %v731_v41  ;;  %v745_v48 = vmul.f32 %v729_v40, %v729_v40 }
 0x37b   : > { %v748_v43 = vadd.f32 %v741_v38, %v740_v37 }
 0x37c   : > { %v746_v50 = vmul.f32 %v738_v44, %v738_v44  ;;  %v747_v52 = vmul.f32 %v739_v47, %v739_v47 }
 0x37d   : > { %v749_v46 = vadd.f32 %v748_v43, %v742_v39 }
 0x37f   : > { %v750_v49 = vadd.f32 %v749_v46, %v743_v42 }
 0x381   : > { %v751_v51 = vadd.f32 %v750_v49, %v744_v45 }
 0x383   : > { %v752_v53 = vadd.f32 %v751_v51, %v745_v48 }
 0x385   : > { %v753_v54 = vadd.f32 %v752_v53, %v746_v50 }
 0x387   : > { %v754_v55 = vadd.f32 %v753_v54, %v747_v52 }
 0x389   : > { %v755_v56 = vrot.slane %v754_v55, 4 }
 0x38b   : > { %v756_v57 = vadd.f32 %v755_v56, %v754_v55 }
 0x38d   : > { %v757_v58 = vrot.slane %v756_v57, 2 }
 0x38f   : > { %v758_v59 = vadd.f32 %v757_v58, %v756_v57 }
 0x391   : > { %v759_v60 = vrot.slane %v758_v59, 1 }
 0x393   : > { %v760_v61 = vadd.f32 %v759_v60, %v758_v59 }
 0x395   : > { %v761_v62 = vmul.f32 0.021276595, %v760_v61 }
 0x397   : > { %1229 = vrsqrt.f32 %v761_v62 }
 0x3a1   : > { %v1230_v63 = vpop.eup %1229 }
 0x3a2   : > { %764 = vst [vmem:[#allocation5] sm:$0x1] %v1230_v63 }
 0x3a3 PF: > { %v986_v0 = vld [vmem:[#allocation4] ss:$0 sm:$0xff]  ;;  %s765_s23 = scalar_lea.vmem [#allocation2], %s1589_s6 }
 0x3a4   : > { %v766_v2 = vld [vmem:[%s765_s23] sm:$0xff]  ;;  %v767_v3 = vld [vmem:[%s765_s23 + $0x8] sm:$0xff]  ;;  %v768_v4 = vld [vmem:[%s765_s23 + $0x10] sm:$0xff] }
 0x3a5   : > { %v777_v5 = vsub.f32 %v766_v2, %v986_v0  ;;  %v778_v6 = vsub.f32 %v767_v3, %v986_v0  ;;  %v779_v7 = vsub.f32 %v768_v4, %v986_v0  ;;  %v769_v8 = vld [vmem:[%s765_s23 + $0x18] sm:$0xff] }
 0x3a6   : > { %v780_v9 = vsub.f32 %v769_v8, %v986_v0 }
 0x3a9   : > { %v987_v1 = vld [vmem:[#allocation5] ss:$0 sm:$0xff] }
 0x3aa   : > { %v788_v10 = vmul.f32 %v987_v1, %v777_v5  ;;  %v789_v11 = vmul.f32 %v987_v1, %v778_v6  ;;  %v790_v12 = vmul.f32 %v987_v1, %v779_v7  ;;  %v791_v13 = vmul.f32 %v987_v1, %v780_v9 }
 0x3ac   : > { %792 = vst [vmem:[%s1595_s14] sm:$0xff] %v788_v10  ;;  %793 = vst [vmem:[%s1595_s14 + $0x8] sm:$0xff] %v789_v11 }
 0x3ad   : > { %794 = vst [vmem:[%s1595_s14 + $0x10] sm:$0xff] %v790_v12  ;;  %795 = vst [vmem:[%s1595_s14 + $0x18] sm:$0xff] %v791_v13 }
 0x3ae PF: > { %p804_p3 = scmp.eq.s32.totalorder %s1401_s19, 2  ;;  %s812_s6 = sshll.u32 %s1595_s14, 4  ;;  %s1669_s6 = int_to_ptr.vmem [resolvable:$true] %s812_s6 }
 0x3af   : > { %s1678_s7 = scalar_lea.sflag [#allocation10], %s193_s21  ;;  %s1309_s24 = scalar_lea.vmem %s1669_s6, 512 }
 0x3b0   : > { %s1773_s18 = smov (!%p804_p3, %s1397_s18), 0  ;;  %p1310_p5 = scmp.ne.s32.totalorder %s1669_s6, %s1309_s24 }
 0x3b1   : > { %s995_s27 = sshll.u32 %s1773_s18, 9  ;;  %p1752_p6 = scmp.ne.s32.totalorder %s1745_s29, 0 }
 0x3b2   : > { %s1674_s12 = scalar_lea.hbm %s1734_s4, %s995_s27  ;;  %s1420_s19 = smov [#allocation13]  }
 0x3b3   : > { %p1311_p9 = pnand %p1310_p5, %p1752_p6  ;;  %s1313_s14 = sshll.u32 %s1420_s19, 4  ;;  %s1314_s14 = int_to_ptr.vmem [resolvable:$false] %s1313_s14 }
 0x3b4   : > { %s1315_s28 = scalar_lea.vmem %s1314_s14, 1024  ;;  %p1316_p11 = scmp.lt.s32.totalorder %s1669_s6, %s1314_s14 }
 0x3b5   : > { %p1312_p10 = pneg %p1311_p9  ;;  %p1317_p0 = scmp.lt.s32.totalorder %s1315_s28, %s1309_s24 }
 0x3b7   : > { %p1318_p1 = por %p1317_p0, %p1316_p11 }
 0x3b9   : > { %p1319_p7 = pnand %p1318_p1, %p1312_p10 }
 0x3bb   : > { %1322 = shalt.err (!%p1319_p7)
}
 0x3bc   : > { %s1323_s18 = scalar_lea.hbm %s1674_s12, 512  ;;  %s1327_s8 = scalar_lea.hbm %s1734_s4, 1024 }
 0x3bd   : > { %p1324_p8 = scmp.ne.s32.totalorder %s1674_s12, %s1323_s18  ;;  %p1328_p12 = scmp.lt.u32.totalorder %s1674_s12, %s1734_s4 }
 0x3be   : > { %p1329_p13 = scmp.lt.u32.totalorder %s1327_s8, %s1323_s18  ;;  %p1331_p5 = scmp.lt.u32.totalorder %s1323_s18, %s1674_s12 }
 0x3bf   : > { %p1325_p2 = pnand %p1324_p8, %p1752_p6 }
 0x3c0   : > { %p1330_p3 = por %p1329_p13, %p1328_p12 }
 0x3c1   : > { %p1326_p4 = pneg %p1325_p2 }
 0x3c2   : > { %p1332_p9 = por %p1331_p5, %p1330_p3 }
 0x3c4   : > { %p1333_p10 = pnand %p1332_p9, %p1326_p4 }
 0x3c6   : > { %1336 = shalt.err (!%p1333_p10)
}
 0x3c7   : > { %s1421_s10 = smov 128   ;;  %s1422_s23 = smov 8  }
 0x3c8   : > { %1104 = dma.vmem_to_hbm [thread:$0]  (%p1752_p6), %s1669_s6, 512, %s1674_s12, %s1678_s7, %s1421_s10, %s1421_s10, %s1422_s23  }
 0x3c9 PF: > { %p1121_p11 = scmp.ge.s32.totalorder %s1413_s22, 2  ;;  %s827_s27 = sand.u32 1, %s1385_s15  }
 0x3ca   : > { %p1753_p0 = scmp.ne.s32.totalorder %s1746_s30, 0  ;;  %s828_s25 = scalar_lea.sflag [#allocation10], %s827_s27 }
 0x3cc   : > { %p1114_p1 = pnand %p1121_p11, %p1753_p0 }
 0x3ce   : > { %1380 = dma.done.wait (!%p1114_p1), %s828_s25, 512  }
 0x3cf   : > { %1382 = vsyncadd (!%p1114_p1), %s828_s25, 4294966784  ;;  %s19_s22 = sadd.s32 1, %s1413_s22   ;;  %s1754_s19 = sld [smem:[#allocation22_spill]] }
 0x3d0   : > { %p16_p7 = scmp.ge.s32.totalorder %s19_s22, 8   ;;  %s1755_s29 = sld [smem:[#allocation23_spill]] }
 0x3d1   : > { %s1756_s21 = sld [smem:[#allocation24_spill]]  ;;  %s1757_s15 = smov %s1389_s16 }
 0x3d2   : > { %s1758_s16 = smov %s1393_s17  ;;  %s1759_s17 = smov %s1527_s11 }
 0x3d3   : > { %s1760_s18 = smov %s1405_s20  ;;  %18 = sbr.rel (!%p16_p7) target bundleno = 7 (0x7), region = 109 }
 0x3d6   : > { %s1761_s20 = smov %s1755_s29 }
 0x3da   :  { %833 = vsyncpa [#allocation9], 1 }
 0x3db   :  { %835 = vsyncpa [#allocation9 + $0x1], 1 }
 0x3dc   :  { %836 = vsyncpa [#allocation12], 1 }
 0x3dd   :  { %837 = vsyncpa [#allocation10], 1 }
 0x3de   :  { %839 = vsyncpa [#allocation10 + $0x1], 1 }
 0x3df   :  { %840 = vsyncmov [#allocation7] }
 0x3e2   :  { %s841_s30 = vpop.sfrf %840 }
 0x3e3   :  { %p993_p6 = scmp.ne.s32.totalorder %s841_s30, 0 }
 0x3e5   :  { %845 = shalt.err (%p993_p6)  }

</bundles_post_ra>
